<compile_context>
chip_gen: v7x
topology: tpu7x:2x2x1
jax: 0.10.0
libtpu: 0.0.40
codegen_flags: <defaults>
</compile_context>

<pallas_src>
import functools

import jax
import jax.numpy as jnp
from jax.experimental import pallas as pl
from jax.experimental.pallas import tpu as pltpu


def _round_up(x, m):
    return (x + m - 1) // m * m


def _pick_tile_rows(dim1, dim2, itemsize, target_block_bytes, min_steps=4):
    """Lane-dense row tiling: ~target_block_bytes per block, >= min_steps grid steps."""
    tile_r = max(8, (target_block_bytes // max(1, dim2 * itemsize)) // 8 * 8)
    # Keep at least `min_steps` grid steps when dim1 allows, so both v7x
    # TensorCores get >= 2 steps each and double-buffering actually overlaps.
    cap = _round_up(-(-dim1 // min_steps), 8)
    tile_r = min(tile_r, cap)
    tile_r = max(8, min(tile_r, _round_up(dim1, 8)))
    rows_p = _round_up(dim1, tile_r)
    return tile_r, rows_p


def _bf16_chunks(v, n_chunks):
    """Split f32 array into n bf16-exact chunks whose f32 sum reconstructs v exactly
    (3 chunks cover a full f32 mantissa)."""
    chunks = []
    rem = v.astype(jnp.float32)
    for _ in range(n_chunks):
        c = rem.astype(jnp.bfloat16)
        rem = rem - c.astype(jnp.float32)
        chunks.append(c)
    return chunks


# ---------------------------------------------------------------------------
# Fast path: group_size is a multiple of 128 -> pure lane-broadcast, no MXU.
# ---------------------------------------------------------------------------
def _fake_quant_lane_kernel(x_ref, p_ref, o_ref, *, group_size, n_groups):
    # x_ref / o_ref : (tile_r, dim2)                 lane-dense
    # p_ref         : (tile_r, 4*G) f32 columns = [scale | inv | lo | hi]
    G = n_groups
    for g in range(G):                      # static unroll, lane-aligned slices
        c0 = g * group_size
        c1 = c0 + group_size
        s = p_ref[:, g:g + 1]               # (tile_r, 1) lane-broadcast operands
        inv = p_ref[:, G + g:G + g + 1]
        lo = p_ref[:, 2 * G + g:2 * G + g + 1]
        hi = p_ref[:, 3 * G + g:3 * G + g + 1]
        x = x_ref[:, c0:c1].astype(jnp.float32)
        xi = jnp.clip(jnp.round(x * inv), lo, hi)   # zp folded into the bounds
        o_ref[:, c0:c1] = (xi * s).astype(o_ref.dtype)


# ---------------------------------------------------------------------------
# Fallback: arbitrary group_size -> one K-merged MXU matmul per broadcast target.
# ---------------------------------------------------------------------------
def _fake_quant_mxu_kernel(x_ref, sc_ref, ic_ref, zc_ref, e_ref, o_ref, *, qmin, qmax):
    # sc/ic/zc_ref : (tile_r, 3*G) bf16 chunk arrays (chunks concatenated along K)
    # e_ref        : (3*G, dim2)  bf16 one-hot expansion, resident (constant index map)
    e = e_ref[...]
    scale_b = jnp.dot(sc_ref[...], e, preferred_element_type=jnp.float32)
    inv_b = jnp.dot(ic_ref[...], e, preferred_element_type=jnp.float32)
    zp_b = jnp.dot(zc_ref[...], e, preferred_element_type=jnp.float32)
    x = x_ref[...].astype(jnp.float32)
    xi = jnp.clip(jnp.round(x * inv_b) + zp_b, float(qmin), float(qmax))
    o_ref[...] = ((xi - zp_b) * scale_b).astype(o_ref.dtype)


def uniform_affine_fake_quant(x, scale, zero_point, *, group_size, n_bits,
                              target_block_bytes=2 << 20):
    """Forward pass of UniformAffineQuantizer.

    x:           (dim1, dim2) float, dim2 % group_size == 0
    scale:       (dim1*dim2//group_size, 1)
    zero_point:  (dim1*dim2//group_size, 1)
    """
    assert 2 <= n_bits <= 16, "bitwidth not supported"
    if n_bits >= 16:
        return x
    qmin = 0
    qmax = 2 ** n_bits - 1

    dim1, dim2 = x.shape
    if group_size == -1:
        group_size = dim2
    assert dim2 % group_size == 0
    G = dim2 // group_size

    # Tiny per-group parameter prep (forward values of clamp_ste / round_ste plus
    # the hoisted per-group reciprocal) — O(n_groups), done once in the wrapper.
    scale_g = jnp.clip(scale.reshape(dim1, G).astype(jnp.float32), 0.0001, 10000.0)
    inv_g = 1.0 / scale_g
    zp_g = jnp.clip(jnp.round(zero_point.reshape(dim1, G).astype(jnp.float32)),
                    float(qmin), float(qmax))

    itemsize = jnp.dtype(x.dtype).itemsize
    tile_r, rows_p = _pick_tile_rows(dim1, dim2, itemsize, target_block_bytes)
    pad = rows_p - dim1
    x_p = jnp.pad(x, ((0, pad), (0, 0))) if pad else x

    grid = (rows_p // tile_r,)
    cparams = pltpu.CompilerParams(
        dimension_semantics=("parallel",),        # shards row tiles across v7x's 2 TCs
        vmem_limit_bytes=32 * 1024 * 1024)        # v5e scoped default is only 16 MiB

    if group_size % 128 == 0:
        # ---- lane-broadcast fast path ----
        lo_g = float(qmin) - zp_g
        hi_g = float(qmax) - zp_g
        params = jnp.concatenate([scale_g, inv_g, lo_g, hi_g], axis=1)   # (dim1, 4G)
        if pad:
            params = jnp.pad(params, ((0, pad), (0, 0)), constant_values=1.0)
        kernel = functools.partial(_fake_quant_lane_kernel,
                                   group_size=group_size, n_groups=G)
        out_p = pl.pallas_call(
            kernel,
            out_shape=jax.ShapeDtypeStruct((rows_p, dim2), x.dtype),
            grid_spec=pltpu.PrefetchScalarGridSpec(
                num_scalar_prefetch=0,
                grid=grid,
                in_specs=[
                    pl.BlockSpec((tile_r, dim2), lambda i: (i, 0)),
                    pl.BlockSpec((tile_r, 4 * G), lambda i: (i, 0)),
                ],
                out_specs=pl.BlockSpec((tile_r, dim2), lambda i: (i, 0)),
            ),
            compiler_params=cparams,
        )(x_p, params)
    else:
        # ---- MXU one-hot fallback, chunks merged along the contraction axis ----
        # 3 bf16 chunks reconstruct any f32 exactly, so each target is bit-exact.
        sc = jnp.concatenate(_bf16_chunks(scale_g, 3), axis=1)   # (dim1, 3G) bf16
        ic = jnp.concatenate(_bf16_chunks(inv_g, 3), axis=1)
        zc = jnp.concatenate(_bf16_chunks(zp_g, 3), axis=1)
        if pad:
            sc = jnp.pad(sc, ((0, pad), (0, 0)))
            ic = jnp.pad(ic, ((0, pad), (0, 0)))
            zc = jnp.pad(zc, ((0, pad), (0, 0)))
        # One-hot expansion, built once here (hoisted out of the kernel) and kept
        # resident in VMEM via a constant index_map.
        col = jnp.arange(dim2)[None, :]
        gid = (jnp.arange(3 * G) % G)[:, None]
        e3 = ((col >= gid * group_size) & (col < (gid + 1) * group_size))
        e3 = e3.astype(jnp.float32).astype(jnp.bfloat16)          # (3G, dim2)

        kernel = functools.partial(_fake_quant_mxu_kernel, qmin=qmin, qmax=qmax)
        out_p = pl.pallas_call(
            kernel,
            out_shape=jax.ShapeDtypeStruct((rows_p, dim2), x.dtype),
            grid_spec=pltpu.PrefetchScalarGridSpec(
                num_scalar_prefetch=0,
                grid=grid,
                in_specs=[
                    pl.BlockSpec((tile_r, dim2), lambda i: (i, 0)),
                    pl.BlockSpec((tile_r, 3 * G), lambda i: (i, 0)),
                    pl.BlockSpec((tile_r, 3 * G), lambda i: (i, 0)),
                    pl.BlockSpec((tile_r, 3 * G), lambda i: (i, 0)),
                    pl.BlockSpec((3 * G, dim2), lambda i: (0, 0)),
                ],
                out_specs=pl.BlockSpec((tile_r, dim2), lambda i: (i, 0)),
            ),
            compiler_params=cparams,
        )(x_p, sc, ic, zc, e3)

    return out_p if pad == 0 else out_p[:dim1]


def init_quantizer_params(weight, *, group_size, n_bits):
    """Deterministic __init__ of UniformAffineQuantizer (plain-JAX glue)."""
    x = weight.reshape(-1, group_size)
    xmin = jnp.min(x, axis=-1, keepdims=True)
    xmax = jnp.max(x, axis=-1, keepdims=True)
    rng = xmax - xmin
    scale = rng / (2 ** n_bits - 1)
    scale = jnp.clip(scale, 0.0001, 10000.0)
    zero_point = -jnp.clip(xmin / scale, -10000.0, 10000.0)
    zero_point = jnp.round(zero_point)
    return scale, zero_point


def _reference_fake_quant(x, scale, zero_point, *, group_size, n_bits):
    """Faithful JAX mirror of UniformAffineQuantizer.fake_quant (forward values)."""
    qmin, qmax = 0.0, float(2 ** n_bits - 1)
    dim1, dim2 = x.shape
    xg = x.reshape(-1, group_size)
    s = jnp.clip(scale, 0.0001, 10000.0)
    zp = jnp.clip(jnp.round(zero_point), qmin, qmax)
    xi = jnp.clip(jnp.round(xg / s) + zp, qmin, qmax)
    return ((xi - zp) * s).reshape(dim1, dim2)


def _check(out, ref, scale, group_size):
    """Kernel uses x * (1/scale) (reciprocal hoisted per group); the torch-mirror
    reference divides.  The only admissible disagreements are sub-ulp ties landing
    exactly on a quantization-bin boundary: bounded per element by that group's
    (clipped) scale and vanishingly rare.  Everything else must match."""
    dim1, dim2 = out.shape
    s = jnp.clip(scale, 0.0001, 10000.0).reshape(dim1, dim2 // group_size)
    bin_full = jnp.repeat(s, group_size, axis=1)
    diff = jnp.abs(out - ref)
    tol = 1e-5 + 1e-5 * jnp.abs(ref)
    assert bool(jnp.all(diff <= bin_full + tol)), float(jnp.max(diff))
    mismatch_frac = float(jnp.mean((diff > tol).astype(jnp.float32)))
    assert mismatch_frac <= 1e-3, mismatch_frac


if __name__ == "__main__":
    key = jax.random.PRNGKey(0)
    k1, k2 = jax.random.split(key)

    # --- Test 1: lane-broadcast fast path (group_size multiple of 128) ---
    n_bits, group_size, dim1, dim2 = 8, 128, 64, 512
    w = jax.random.normal(k1, (dim1, dim2), dtype=jnp.float32)
    scale, zero_point = init_quantizer_params(w, group_size=group_size, n_bits=n_bits)
    out = jax.block_until_ready(
        uniform_affine_fake_quant(w, scale, zero_point,
                                  group_size=group_size, n_bits=n_bits))
    ref = _reference_fake_quant(w, scale, zero_point,
                                group_size=group_size, n_bits=n_bits)
    assert out.shape == w.shape and out.dtype == w.dtype
    assert bool(jnp.all(jnp.isfinite(out)))
    _check(out, ref, scale, group_size)

    # --- Test 2: MXU one-hot fallback (group_size % 128 != 0) + row padding ---
    n_bits, group_size, dim1, dim2 = 4, 64, 30, 256
    w2 = jax.random.normal(k2, (dim1, dim2), dtype=jnp.float32)
    scale2, zero_point2 = init_quantizer_params(w2, group_size=group_size, n_bits=n_bits)
    out2 = jax.block_until_ready(
        uniform_affine_fake_quant(w2, scale2, zero_point2,
                                  group_size=group_size, n_bits=n_bits))
    ref2 = _reference_fake_quant(w2, scale2, zero_point2,
                                 group_size=group_size, n_bits=n_bits)
    assert out2.shape == w2.shape and out2.dtype == w2.dtype
    assert bool(jnp.all(jnp.isfinite(out2)))
    _check(out2, ref2, scale2, group_size)

    print("KERNEL_OK")
</pallas_src>

<mosaic_0001>
module attributes {stable_mosaic.version = 11 : i64} {
  func.func @_fake_quant_lane_kernel(%arg0: i32, %arg1: memref<16x512xf32, #tpu.memory_space<vmem>>, %arg2: memref<16x16xf32, #tpu.memory_space<vmem>>, %arg3: memref<16x512xf32, #tpu.memory_space<vmem>>) attributes {dimension_semantics = [#tpu.dimension_semantics<parallel>], iteration_bounds = array<i64: 4>, scalar_prefetch = 0 : i64, scratch_operands = 0 : i64, tpu.core_type = #tpu.core_type<tc>, window_params = [{transform_indices = @transform_0, window_bounds = array<i64: 16, 512>}, {transform_indices = @transform_1, window_bounds = array<i64: 16, 16>}, {transform_indices = @transform_2, window_bounds = array<i64: 16, 512>}]} {
    %c0 = arith.constant 0 : index
    %c0_0 = arith.constant 0 : index
    %0 = vector.load %arg2[%c0, %c0_0] : memref<16x16xf32, #tpu.memory_space<vmem>>, vector<16x1xf32>
    %c0_1 = arith.constant 0 : index
    %c4 = arith.constant 4 : index
    %1 = vector.load %arg2[%c0_1, %c4] : memref<16x16xf32, #tpu.memory_space<vmem>>, vector<16x1xf32>
    %c0_2 = arith.constant 0 : index
    %c8 = arith.constant 8 : index
    %2 = vector.load %arg2[%c0_2, %c8] : memref<16x16xf32, #tpu.memory_space<vmem>>, vector<16x1xf32>
    %c0_3 = arith.constant 0 : index
    %c12 = arith.constant 12 : index
    %3 = vector.load %arg2[%c0_3, %c12] : memref<16x16xf32, #tpu.memory_space<vmem>>, vector<16x1xf32>
    %c0_4 = arith.constant 0 : index
    %c0_5 = arith.constant 0 : index
    %4 = vector.load %arg1[%c0_4, %c0_5] : memref<16x512xf32, #tpu.memory_space<vmem>>, vector<16x128xf32>
    %5 = vector.broadcast %1 : vector<16x1xf32> to vector<16x128xf32>
    %6 = arith.mulf %4, %5 : vector<16x128xf32>
    %7 = math.roundeven %6 : vector<16x128xf32>
    %8 = vector.broadcast %2 : vector<16x1xf32> to vector<16x128xf32>
    %9 = arith.maximumf %8, %7 : vector<16x128xf32>
    %10 = vector.broadcast %3 : vector<16x1xf32> to vector<16x128xf32>
    %11 = arith.minimumf %10, %9 : vector<16x128xf32>
    %12 = vector.broadcast %0 : vector<16x1xf32> to vector<16x128xf32>
    %13 = arith.mulf %11, %12 : vector<16x128xf32>
    %c0_6 = arith.constant 0 : index
    %c0_7 = arith.constant 0 : index
    %14 = vector.load %arg3[%c0_6, %c0_7] : memref<16x512xf32, #tpu.memory_space<vmem>>, vector<16x128xf32>
    tpu.vector_store %arg3[%c0_6, %c0_7], %13 {strides = array<i32>} : memref<16x512xf32, #tpu.memory_space<vmem>>, vector<16x128xf32>,
    %c0_8 = arith.constant 0 : index
    %c1 = arith.constant 1 : index
    %15 = vector.load %arg2[%c0_8, %c1] : memref<16x16xf32, #tpu.memory_space<vmem>>, vector<16x1xf32>
    %c0_9 = arith.constant 0 : index
    %c5 = arith.constant 5 : index
    %16 = vector.load %arg2[%c0_9, %c5] : memref<16x16xf32, #tpu.memory_space<vmem>>, vector<16x1xf32>
    %c0_10 = arith.constant 0 : index
    %c9 = arith.constant 9 : index
    %17 = vector.load %arg2[%c0_10, %c9] : memref<16x16xf32, #tpu.memory_space<vmem>>, vector<16x1xf32>
    %c0_11 = arith.constant 0 : index
    %c13 = arith.constant 13 : index
    %18 = vector.load %arg2[%c0_11, %c13] : memref<16x16xf32, #tpu.memory_space<vmem>>, vector<16x1xf32>
    %c0_12 = arith.constant 0 : index
    %c128 = arith.constant 128 : index
    %19 = vector.load %arg1[%c0_12, %c128] : memref<16x512xf32, #tpu.memory_space<vmem>>, vector<16x128xf32>
    %20 = vector.broadcast %16 : vector<16x1xf32> to vector<16x128xf32>
    %21 = arith.mulf %19, %20 : vector<16x128xf32>
    %22 = math.roundeven %21 : vector<16x128xf32>
    %23 = vector.broadcast %17 : vector<16x1xf32> to vector<16x128xf32>
    %24 = arith.maximumf %23, %22 : vector<16x128xf32>
    %25 = vector.broadcast %18 : vector<16x1xf32> to vector<16x128xf32>
    %26 = arith.minimumf %25, %24 : vector<16x128xf32>
    %27 = vector.broadcast %15 : vector<16x1xf32> to vector<16x128xf32>
    %28 = arith.mulf %26, %27 : vector<16x128xf32>
    %c0_13 = arith.constant 0 : index
    %c128_14 = arith.constant 128 : index
    %29 = vector.load %arg3[%c0_13, %c128_14] : memref<16x512xf32, #tpu.memory_space<vmem>>, vector<16x128xf32>
    tpu.vector_store %arg3[%c0_13, %c128_14], %28 {strides = array<i32>} : memref<16x512xf32, #tpu.memory_space<vmem>>, vector<16x128xf32>,
    %c0_15 = arith.constant 0 : index
    %c2 = arith.constant 2 : index
    %30 = vector.load %arg2[%c0_15, %c2] : memref<16x16xf32, #tpu.memory_space<vmem>>, vector<16x1xf32>
    %c0_16 = arith.constant 0 : index
    %c6 = arith.constant 6 : index
    %31 = vector.load %arg2[%c0_16, %c6] : memref<16x16xf32, #tpu.memory_space<vmem>>, vector<16x1xf32>
    %c0_17 = arith.constant 0 : index
    %c10 = arith.constant 10 : index
    %32 = vector.load %arg2[%c0_17, %c10] : memref<16x16xf32, #tpu.memory_space<vmem>>, vector<16x1xf32>
    %c0_18 = arith.constant 0 : index
    %c14 = arith.constant 14 : index
    %33 = vector.load %arg2[%c0_18, %c14] : memref<16x16xf32, #tpu.memory_space<vmem>>, vector<16x1xf32>
    %c0_19 = arith.constant 0 : index
    %c256 = arith.constant 256 : index
    %34 = vector.load %arg1[%c0_19, %c256] : memref<16x512xf32, #tpu.memory_space<vmem>>, vector<16x128xf32>
    %35 = vector.broadcast %31 : vector<16x1xf32> to vector<16x128xf32>
    %36 = arith.mulf %34, %35 : vector<16x128xf32>
    %37 = math.roundeven %36 : vector<16x128xf32>
    %38 = vector.broadcast %32 : vector<16x1xf32> to vector<16x128xf32>
    %39 = arith.maximumf %38, %37 : vector<16x128xf32>
    %40 = vector.broadcast %33 : vector<16x1xf32> to vector<16x128xf32>
    %41 = arith.minimumf %40, %39 : vector<16x128xf32>
    %42 = vector.broadcast %30 : vector<16x1xf32> to vector<16x128xf32>
    %43 = arith.mulf %41, %42 : vector<16x128xf32>
    %c0_20 = arith.constant 0 : index
    %c256_21 = arith.constant 256 : index
    %44 = vector.load %arg3[%c0_20, %c256_21] : memref<16x512xf32, #tpu.memory_space<vmem>>, vector<16x128xf32>
    tpu.vector_store %arg3[%c0_20, %c256_21], %43 {strides = array<i32>} : memref<16x512xf32, #tpu.memory_space<vmem>>, vector<16x128xf32>,
    %c0_22 = arith.constant 0 : index
    %c3 = arith.constant 3 : index
    %45 = vector.load %arg2[%c0_22, %c3] : memref<16x16xf32, #tpu.memory_space<vmem>>, vector<16x1xf32>
    %c0_23 = arith.constant 0 : index
    %c7 = arith.constant 7 : index
    %46 = vector.load %arg2[%c0_23, %c7] : memref<16x16xf32, #tpu.memory_space<vmem>>, vector<16x1xf32>
    %c0_24 = arith.constant 0 : index
    %c11 = arith.constant 11 : index
    %47 = vector.load %arg2[%c0_24, %c11] : memref<16x16xf32, #tpu.memory_space<vmem>>, vector<16x1xf32>
    %c0_25 = arith.constant 0 : index
    %c15 = arith.constant 15 : index
    %48 = vector.load %arg2[%c0_25, %c15] : memref<16x16xf32, #tpu.memory_space<vmem>>, vector<16x1xf32>
    %c0_26 = arith.constant 0 : index
    %c384 = arith.constant 384 : index
    %49 = vector.load %arg1[%c0_26, %c384] : memref<16x512xf32, #tpu.memory_space<vmem>>, vector<16x128xf32>
    %50 = vector.broadcast %46 : vector<16x1xf32> to vector<16x128xf32>
    %51 = arith.mulf %49, %50 : vector<16x128xf32>
    %52 = math.roundeven %51 : vector<16x128xf32>
    %53 = vector.broadcast %47 : vector<16x1xf32> to vector<16x128xf32>
    %54 = arith.maximumf %53, %52 : vector<16x128xf32>
    %55 = vector.broadcast %48 : vector<16x1xf32> to vector<16x128xf32>
    %56 = arith.minimumf %55, %54 : vector<16x128xf32>
    %57 = vector.broadcast %45 : vector<16x1xf32> to vector<16x128xf32>
    %58 = arith.mulf %56, %57 : vector<16x128xf32>
    %c0_27 = arith.constant 0 : index
    %c384_28 = arith.constant 384 : index
    %59 = vector.load %arg3[%c0_27, %c384_28] : memref<16x512xf32, #tpu.memory_space<vmem>>, vector<16x128xf32>
    tpu.vector_store %arg3[%c0_27, %c384_28], %58 {strides = array<i32>} : memref<16x512xf32, #tpu.memory_space<vmem>>, vector<16x128xf32>,
    return
  }
  func.func @transform_0(%arg0: i32) -> (i32, i32) {
    %c0_i32 = arith.constant 0 : i32
    %c0_i32_0 = arith.constant 0 : i32
    return %arg0, %c0_i32 : i32, i32
  }
  func.func @transform_1(%arg0: i32) -> (i32, i32) {
    %c0_i32 = arith.constant 0 : i32
    %c0_i32_0 = arith.constant 0 : i32
    return %arg0, %c0_i32 : i32, i32
  }
  func.func @transform_2(%arg0: i32) -> (i32, i32) {
    %c0_i32 = arith.constant 0 : i32
    %c0_i32_0 = arith.constant 0 : i32
    return %arg0, %c0_i32 : i32, i32
  }
}

</mosaic_0001>

<bundles_post_ra>
// kernel: tpu_custom_call.1
= control target key start
LH: loop header
LB: loop body
LE: loop exit
PB: predicated region body
PF: predicated region fallthrough
CT: control target
= control target key end

     0   :  { %7 = vsyncpa [#allocation3], 0  ;;  %s970_s0 = inlined_call_operand.hbm [shape: f32[64,512], index: 0, kind: input, shape index: {}]   ;;  %s971_s1 = inlined_call_operand.vmem [shape: f32[64,16], index: 1, kind: input, shape index: {}]   ;;  %s972_s2 = inlined_call_operand.hbm [shape: f32[64,512], index: 2, kind: output, shape index: {}]  }
   0x1   :  { %9 = vsyncpa [#allocation3 + $0x1], 0 }
   0x2   :  { %10 = vsyncpa [#allocation4], 0 }
   0x3   :  { %12 = vsyncpa [#allocation4 + $0x1], 0  ;;  %s745_s9 = smov 0   ;;  %s747_s10 = smov 0  }
   0x4   :  { %s749_s11 = smov 0   ;;  %s751_s12 = smov 0  }
   0x5 LB: > { %s766_s13 = sadd.s32 4294967295, %s706_s12   ;;  %s487_s14 = sadd.s32 4294967294, %s706_s12   ;;  %s706_s12 = sphi %s751_s12, %s984_s12   ;;  %s702_s11 = sphi %s749_s11, %s983_s11   ;;  %s698_s10 = sphi %s747_s10, %s982_s10   ;;  %s694_s9 = sphi %s745_s9, %s981_s9  }
   0x6   : > { %s770_s15 = sadd.s32 1, %s706_s12   ;;  %s25_s16 = sadd.s32 1, %s702_s11 }
   0x7   : > { %s22_s17 = ssub.s32 %s706_s12, %s770_s15  ;;  %p32_p0 = scmp.ne.s32.totalorder %s702_s11, %s698_s10 }
   0x8   : > { %p23_p1 = scmp.eq.s32.totalorder %s22_s17, 0  ;;  %p33_p2 = scmp.eq.s32.totalorder %s706_s12, 0 }
   0x9   : > { %p38_p3 = scmp.ne.s32.totalorder %s698_s10, %s694_s9  ;;  %p39_p4 = scmp.eq.s32.totalorder %s766_s13, 0 }
   0xa   : > { %s782_s18 = scalar_select %p23_p1, %s702_s11, %s25_s16  }
   0xb   : > { %p784_p5 = por %p33_p2, %p32_p0  ;;  %p788_p6 = por %p39_p4, %p38_p3 }
   0xc   : > { %p88_p7 = scmp.eq.s32.totalorder %s766_s13, 3  ;;  %p94_p8 = scmp.eq.s32.totalorder %s487_s14, 3 }
   0xd   : > { %p529_p9 = scmp.lt.s32.totalorder %s706_s12, 4  ;;  %s114_s23 = sand.u32 1, %s702_s11  }
   0xe   : > { %p794_p10 = por %p88_p7, %p32_p0  ;;  %p798_p11 = por %p94_p8, %p38_p3 }
   0xf   : > { %s506_s24 = sshll.u32 %s706_s12, 10  ;;  %s490_s25 = sshll.u32 %s114_s23, 6 }
  0x10   : > { %s976_s21 = scalar_select %p794_p10, 1, 0 }
  0x11   : > { %s977_s22 = scalar_select %p798_p11, 1, 0 }
  0x12   : > { %s807_s28 = scalar_lea.hbm %s970_s0, %s506_s24  ;;  %s118_s29 = scalar_lea.vmem [#allocation2], %s490_s25 }
  0x13   : > { %s126_s30 = sshll.u32 %s118_s29, 4  ;;  %p811_p12 = pnand %p529_p9, %p784_p5  ;;  %s815_s30 = int_to_ptr.vmem [resolvable:$true] %s126_s30 }
  0x14   : > { %s817_s4 = scalar_lea.sflag [#allocation3], %s114_s23  ;;  %s610_s5 = scalar_lea.hbm %s807_s28, 1024 }
  0x15   : > { %p611_p13 = scmp.ne.s32.totalorder %s807_s28, %s610_s5  ;;  %p612_p0 = pneg %p811_p12 }
  0x16   : > { %s615_s8 = scalar_lea.hbm %s970_s0, 4096  ;;  %p616_p3 = scmp.lt.u32.totalorder %s807_s28, %s970_s0 }
  0x17   : > { %p613_p1 = pnand %p612_p0, %p611_p13  ;;  %p617_p4 = scmp.lt.u32.totalorder %s615_s8, %s610_s5 }
  0x18   : > { %p619_p7 = scmp.lt.u32.totalorder %s610_s5, %s807_s28 }
  0x19   : > { %p614_p2 = pneg %p613_p1  ;;  %p618_p5 = por %p617_p4, %p616_p3 }
  0x1b   : > { %p620_p8 = por %p619_p7, %p618_p5 }
  0x1d   : > { %p621_p9 = pnand %p620_p8, %p614_p2 }
  0x1f   : > { %624 = shalt.err (!%p621_p9)
}
  0x20   : > { %s625_s17 = scalar_lea.vmem %s815_s30, 1024  ;;  %s708_s19 = smov [#allocation2]  }
  0x21   : > { %p626_p13 = scmp.ne.s32.totalorder %s815_s30, %s625_s17  ;;  %s630_s23 = sshll.u32 %s708_s19, 4  ;;  %s631_s23 = int_to_ptr.vmem [resolvable:$false] %s630_s23 }
  0x22   : > { %s632_s24 = scalar_lea.vmem %s631_s23, 2048  ;;  %p633_p10 = scmp.lt.s32.totalorder %s815_s30, %s631_s23 }
  0x23   : > { %p628_p1 = pnand %p626_p13, %p612_p0  ;;  %p634_p3 = scmp.lt.s32.totalorder %s632_s24, %s625_s17 }
  0x25   : > { %p629_p11 = pneg %p628_p1  ;;  %p635_p4 = por %p634_p3, %p633_p10 }
  0x27   : > { %p636_p5 = pnand %p635_p4, %p629_p11 }
  0x29   : > { %639 = shalt.err (!%p636_p5)
}
  0x2a   : > { %s709_s25 = smov 512   ;;  %s710_s26 = smov 32  }
  0x2b   : > { %524 = dma.hbm_to_vmem [thread:$0]  (!%p811_p12), %s807_s28, 1024, %s815_s30, %s817_s4, %s709_s25, %s709_s25, %s710_s26  }
  0x2c   : > { %p494_p0 = scmp.ge.s32.totalorder %s706_s12, 1  ;;  %p143_p2 = scmp.lt.s32.totalorder %s706_s12, 5 }
  0x2e   : > { %p144_p7 = pnand %p494_p0, %p143_p2 }
  0x2f   : > { %s848_s27 = sand.u32 (!%p144_p7), 1, %s698_s10  }
  0x30   : > { %147 = sbr.rel (%p144_p7) target bundleno = 299 (0x12b), region = 28  ;;  %s495_s29 = sshll.u32 (!%p144_p7), %s848_s27, 6 }
  0x31   : > { %s150_s5 = scalar_lea.sflag (!%p144_p7), [#allocation3], %s848_s27  ;;  %s854_s6 = scalar_lea.vmem (!%p144_p7), [#allocation2], %s495_s29 }
  0x37   : > { %685 = dma.done.wait (%p788_p6), %s150_s5, 1024  }
  0x38   : > { %687 = vsyncadd (%p788_p6), %s150_s5, 4294966272  ;;  %s497_s28 = sshll.u32 %s766_s13, 1  ;;  %v711_v0 = vmov 8   ;;  %v712_v1 = vmov 4   ;;  %v713_v4 = vmov 12   ;;  %v714_v5 = vmov 0  }
  0x39   : > { %584 = vset.pattern.permute.xlu1 %v711_v0  ;;  %583 = vset.pattern.permute.xlu0 %v712_v1  ;;  %p181_p10 = scmp.lt.s32.totalorder %s497_s28, 7  ;;  %v715_v6 = vmov 5   ;;  %v716_v7 = vmov 9   ;;  %v717_v8 = vmov 6   ;;  %v718_v9 = vmov 7   ;;  %v189_v19 = vld [vmem:[%s854_s6] sm:$0xff] }
  0x3a   : > { %v719_v10 = vmov 13   ;;  %v720_v11 = vmov 11   ;;  %v721_v12 = vmov 14   ;;  %v722_v13 = vmov 15   ;;  %v190_v21 = vld [vmem:[%s854_s6 + $0x20] sm:$0xff]  ;;  %s904_s20 = scalar_lea.vmem [#allocation5], %s495_s29 }
  0x3b   : > { %s986_s28 = smov (!%p181_p10, %s497_s28), 7  ;;  %v723_v14 = vmov 10   ;;  %v724_v15 = vmov 2   ;;  %v725_v16 = vmov 3   ;;  %v726_v17 = vmov 1   ;;  %v289_v46 = vld [vmem:[%s854_s6 + $0x10] sm:$0xff] }
  0x3c   : > { %s498_s30 = sshll.u32 %s986_s28, 3  ;;  %v340_v53 = vld [vmem:[%s854_s6 + $0x38] sm:$0xff]  ;;  %s402_s8 = sshll.u32 %s904_s20, 4  ;;  %s921_s8 = int_to_ptr.vmem [resolvable:$true] %s402_s8 }
  0x3d   : > { %s184_s7 = scalar_lea.vmem %s971_s1, %s498_s30  ;;  %s508_s14 = sshll.u32 %s766_s13, 10 }
  0x3e   : > { %v864_v2 = vld [vmem:[%s184_s7] sm:$0xff]  ;;  %v868_v3 = vld [vmem:[%s184_s7 + $0x8] sm:$0xff]  ;;  %s926_s19 = scalar_lea.hbm %s972_s2, %s508_s14  ;;  %s388_s23 = scalar_lea.sflag [#allocation4], %s848_s27 }
  0x3f   : > { %206 = vperm.xlu1 %584, %v864_v2   ;;  %193 = vperm.xlu0 %583, %v864_v2   ;;  %s640_s24 = scalar_lea.vmem %s921_s8, 1024  ;;  %p979_p11 = scmp.ne.s32.totalorder %s976_s21, 0 }
  0x40   : > { %p641_p6 = scmp.ne.s32.totalorder %s921_s8, %s640_s24  ;;  %s727_s13 = smov [#allocation5]  }
  0x41   : > { %s644_s25 = sshll.u32 %s727_s13, 4  ;;  %s645_s25 = int_to_ptr.vmem [resolvable:$false] %s644_s25 }
  0x42   : > { %p642_p12 = pnand %p641_p6, %p979_p11  ;;  %s646_s26 = scalar_lea.vmem %s645_s25, 2048 }
  0x43   : > { %210 = vperm.xlu1 %584, %v868_v3   ;;  %198 = vperm.xlu0 %583, %v868_v3   ;;  %p647_p9 = scmp.lt.s32.totalorder %s921_s8, %s645_s25  ;;  %p648_p13 = scmp.lt.s32.totalorder %s646_s26, %s640_s24 }
  0x44   : > { %p643_p8 = pneg %p642_p12 }
  0x45   : > { %p649_p1 = por %p648_p13, %p647_p9 }
  0x47   : > { %586 = vset.pattern.permute.xlu1 %v713_v4  ;;  %585 = vset.pattern.permute.xlu0 %v713_v4  ;;  %v239_v4 = vld [vmem:[%s854_s6 + $0x8] sm:$0xff]  ;;  %p650_p3 = pnand %p649_p1, %p643_p8 }
  0x48   : > { %220 = vperm.xlu1 %586, %v868_v3   ;;  %216 = vperm.xlu0 %585, %v864_v2  }
  0x4c   : > { %587 = vset.pattern.permute.xlu1 %v714_v5  ;;  %588 = vset.pattern.permute.xlu0 %v714_v5 }
  0x4d   : > { %226 = vperm.xlu1 %587, %v864_v2   ;;  %230 = vperm.xlu0 %588, %v868_v3  }
  0x51   : > { %589 = vset.pattern.permute.xlu1 %v715_v6  ;;  %590 = vset.pattern.permute.xlu0 %v716_v7  ;;  %v240_v6 = vld [vmem:[%s854_s6 + $0x28] sm:$0xff] }
  0x52   : > { %243 = vperm.xlu1 %589, %v864_v2   ;;  %256 = vperm.xlu0 %590, %v864_v2  }
  0x56   : > { %248 = vperm.xlu1 %589, %v868_v3   ;;  %593 = vset.pattern.permute.xlu0 %v717_v8 }
  0x57   : > { %293 = vperm.xlu0 %593, %v864_v2  }
  0x5a   : > { %591 = vset.pattern.permute.xlu1 %v716_v7 }
  0x5b   : > { %260 = vperm.xlu1 %591, %v868_v3   ;;  %596 = vset.pattern.permute.xlu0 %v718_v9 }
  0x5c   : > { %348 = vperm.xlu0 %596, %v868_v3  }
  0x5f   : > { %592 = vset.pattern.permute.xlu1 %v719_v10 }
  0x60   : > { %266 = vperm.xlu1 %592, %v864_v2   ;;  %598 = vset.pattern.permute.xlu0 %v720_v11 }
  0x61   : > { %356 = vperm.xlu0 %598, %v864_v2  }
  0x64   : > { %594 = vset.pattern.permute.xlu1 %v717_v8 }
  0x65   : > { %298 = vperm.xlu1 %594, %v868_v3   ;;  %601 = vset.pattern.permute.xlu0 %v721_v12 }
  0x66   : > { %316 = vperm.xlu0 %601, %v864_v2  }
  0x69   : > { %595 = vset.pattern.permute.xlu1 %v718_v9 }
  0x6a   : > { %343 = vperm.xlu1 %595, %v864_v2   ;;  %604 = vset.pattern.permute.xlu0 %v722_v13 }
  0x6b   : > { %370 = vperm.xlu0 %604, %v868_v3  }
  0x6e   : > { %597 = vset.pattern.permute.xlu1 %v723_v14 }
  0x6f   : > { %306 = vperm.xlu1 %597, %v864_v2   ;;  %606 = vset.pattern.permute.xlu0 %v724_v15 }
  0x70   : > { %326 = vperm.xlu0 %606, %v864_v2  }
  0x73   : > { %310 = vperm.xlu1 %597, %v868_v3  }
  0x74   : > { %609 = vset.pattern.permute.xlu0 %v725_v16 }
  0x75   : > { %380 = vperm.xlu0 %609, %v868_v3  }
  0x77   : > { %599 = vset.pattern.permute.xlu1 %v720_v11 }
  0x78   : > { %360 = vperm.xlu1 %599, %v868_v3  }
  0x7c   : > { %600 = vset.pattern.permute.xlu1 %v719_v10 }
  0x7d   : > { %270 = vperm.xlu1 %600, %v868_v3  }
  0x81   : > { %602 = vset.pattern.permute.xlu1 %v721_v12 }
  0x82   : > { %320 = vperm.xlu1 %602, %v868_v3  }
  0x86   : > { %603 = vset.pattern.permute.xlu1 %v722_v13  ;;  %v290_v13 = vld [vmem:[%s854_s6 + $0x30] sm:$0xff] }
  0x87   : > { %366 = vperm.xlu1 %603, %v864_v2  }
  0x8b   : > { %605 = vset.pattern.permute.xlu1 %v726_v17 }
  0x8c   : > { %276 = vperm.xlu1 %605, %v864_v2  }
  0x90   : > { %280 = vperm.xlu1 %605, %v868_v3  }
  0x94   : > { %607 = vset.pattern.permute.xlu1 %v724_v15 }
  0x95   : > { %330 = vperm.xlu1 %607, %v868_v3  }
  0x99   : > { %608 = vset.pattern.permute.xlu1 %v725_v16  ;;  %v339_v16 = vld [vmem:[%s854_s6 + $0x18] sm:$0xff] }
  0x9a   : > { %376 = vperm.xlu1 %608, %v864_v2  }
  0xbe   : > { %v207_v18 = vpop.permute.xlu1 %206  ;;  %v194_v20 = vpop.permute.xlu0 %193 }
  0xbf   : > { %v201_v22 = vmul.f32 %v194_v20, %v189_v19 }
  0xc1   : > { %v509_v26 = vround.rtne.f32 %v201_v22 }
  0xc2   : > { %v211_v23 = vpop.permute.xlu1 %210  ;;  %v199_v24 = vpop.permute.xlu0 %198 }
  0xc3   : > { %v202_v25 = vmul.f32 %v199_v24, %v190_v21  ;;  %v213_v31 = vmax.f32 %v207_v18, %v509_v26 }
  0xc5   : > { %v510_v27 = vround.rtne.f32 %v202_v25 }
  0xc7   : > { %v221_v28 = vpop.permute.xlu1 %220  ;;  %v214_v29 = vmax.f32 %v211_v23, %v510_v27  ;;  %v217_v30 = vpop.permute.xlu0 %216 }
  0xc8   : > { %v223_v33 = vmin.f32 %v217_v30, %v213_v31 }
  0xc9   : > { %v224_v32 = vmin.f32 %v221_v28, %v214_v29 }
  0xcc   : > { %v227_v34 = vpop.permute.xlu1 %226  ;;  %v231_v35 = vpop.permute.xlu0 %230 }
  0xcd   : > { %v233_v36 = vmul.f32 %v227_v34, %v223_v33  ;;  %v234_v37 = vmul.f32 %v231_v35, %v224_v32 }
  0xcf   : > { %235 = vst [vmem:[%s904_s20] sm:$0xff] %v233_v36  ;;  %236 = vst [vmem:[%s904_s20 + $0x20] sm:$0xff] %v234_v37 }
  0xd1   : > { %v244_v38 = vpop.permute.xlu1 %243  ;;  %v257_v39 = vpop.permute.xlu0 %256 }
  0xd2   : > { %v251_v5 = vmul.f32 %v244_v38, %v239_v4 }
  0xd4   : > { %v511_v8 = vround.rtne.f32 %v251_v5 }
  0xd5   : > { %v249_v40 = vpop.permute.xlu1 %248 }
  0xd6   : > { %v294_v41 = vpop.permute.xlu0 %293  ;;  %v252_v9 = vmul.f32 %v249_v40, %v240_v6  ;;  %v263_v12 = vmax.f32 %v257_v39, %v511_v8 }
  0xd7   : > { %v301_v49 = vmul.f32 %v294_v41, %v289_v46 }
  0xd8   : > { %v512_v11 = vround.rtne.f32 %v252_v9 }
  0xd9   : > { %v513_v52 = vround.rtne.f32 %v301_v49 }
  0xda   : > { %v261_v42 = vpop.permute.xlu1 %260 }
  0xdb   : > { %v349_v43 = vpop.permute.xlu0 %348  ;;  %v264_v18 = vmax.f32 %v261_v42, %v512_v11 }
  0xdc   : > { %v352_v56 = vmul.f32 %v349_v43, %v340_v53 }
  0xde   : > { %v516_v61 = vround.rtne.f32 %v352_v56 }
  0xdf   : > { %v267_v44 = vpop.permute.xlu1 %266 }
  0xe0   : > { %v357_v45 = vpop.permute.xlu0 %356  ;;  %v273_v14 = vmin.f32 %v267_v44, %v263_v12 }
  0xe4   : > { %v299_v47 = vpop.permute.xlu1 %298 }
  0xe5   : > { %v317_v48 = vpop.permute.xlu0 %316  ;;  %v302_v15 = vmul.f32 %v299_v47, %v290_v13 }
  0xe7   : > { %v514_v22 = vround.rtne.f32 %v302_v15 }
  0xe9   : > { %v344_v50 = vpop.permute.xlu1 %343 }
  0xea   : > { %v371_v51 = vpop.permute.xlu0 %370  ;;  %v351_v20 = vmul.f32 %v344_v50, %v339_v16 }
  0xec   : > { %v515_v26 = vround.rtne.f32 %v351_v20 }
  0xee   : > { %v307_v54 = vpop.permute.xlu1 %306  ;;  %v363_v30 = vmax.f32 %v357_v45, %v515_v26 }
  0xef   : > { %v313_v55 = vmax.f32 %v307_v54, %v513_v52  ;;  %v327_v57 = vpop.permute.xlu0 %326 }
  0xf1   : > { %v323_v58 = vmin.f32 %v317_v48, %v313_v55 }
  0xf2   : > { %v311_v59 = vpop.permute.xlu1 %310 }
  0xf3   : > { %v333_v60 = vmul.f32 %v327_v57, %v323_v58  ;;  %v314_v25 = vmax.f32 %v311_v59, %v514_v22 }
  0xf4   : > { %v381_v0 = vpop.permute.xlu0 %380 }
  0xf5   : > { %335 = vst [vmem:[%s904_s20 + $0x10] sm:$0xff] %v333_v60 }
  0xf7   : > { %v361_v62 = vpop.permute.xlu1 %360 }
  0xf8   : > { %v364_v63 = vmax.f32 %v361_v62, %v516_v61 }
  0xfa   : > { %v374_v1 = vmin.f32 %v371_v51, %v364_v63 }
  0xfc   : > { %v384_v2 = vmul.f32 %v381_v0, %v374_v1  ;;  %v271_v3 = vpop.permute.xlu1 %270 }
  0xfd   : > { %v274_v21 = vmin.f32 %v271_v3, %v264_v18 }
  0xfe   : > { %386 = vst [vmem:[%s904_s20 + $0x38] sm:$0xff] %v384_v2 }
 0x101   : > { %v321_v7 = vpop.permute.xlu1 %320 }
 0x102   : > { %v324_v27 = vmin.f32 %v321_v7, %v314_v25 }
 0x106   : > { %v367_v10 = vpop.permute.xlu1 %366 }
 0x107   : > { %v373_v31 = vmin.f32 %v367_v10, %v363_v30 }
 0x10b   : > { %v277_v17 = vpop.permute.xlu1 %276 }
 0x10c   : > { %v283_v19 = vmul.f32 %v277_v17, %v273_v14 }
 0x10e   : > { %285 = vst [vmem:[%s904_s20 + $0x8] sm:$0xff] %v283_v19 }
 0x10f   : > { %v281_v23 = vpop.permute.xlu1 %280 }
 0x110   : > { %v284_v24 = vmul.f32 %v281_v23, %v274_v21 }
 0x112   : > { %286 = vst [vmem:[%s904_s20 + $0x28] sm:$0xff] %v284_v24 }
 0x114   : > { %v331_v28 = vpop.permute.xlu1 %330 }
 0x115   : > { %v334_v29 = vmul.f32 %v331_v28, %v324_v27 }
 0x117   : > { %336 = vst [vmem:[%s904_s20 + $0x30] sm:$0xff] %v334_v29 }
 0x119   : > { %v377_v32 = vpop.permute.xlu1 %376 }
 0x11a   : > { %v383_v33 = vmul.f32 %v377_v32, %v373_v31 }
 0x11c   : > { %385 = vst [vmem:[%s904_s20 + $0x18] sm:$0xff] %v383_v33 }
 0x11d   : > { %653 = shalt.err (!%p650_p3)
}
 0x11e   : > { %s654_s29 = scalar_lea.hbm %s926_s19, 1024  ;;  %s658_s28 = scalar_lea.hbm %s972_s2, 4096 }
 0x11f   : > { %p655_p4 = scmp.ne.s32.totalorder %s926_s19, %s654_s29  ;;  %p659_p2 = scmp.lt.u32.totalorder %s926_s19, %s972_s2 }
 0x120   : > { %p660_p7 = scmp.lt.u32.totalorder %s658_s28, %s654_s29  ;;  %p662_p6 = scmp.lt.u32.totalorder %s654_s29, %s926_s19 }
 0x121   : > { %p656_p5 = pnand %p655_p4, %p979_p11 }
 0x122   : > { %p661_p10 = por %p660_p7, %p659_p2 }
 0x123   : > { %p657_p0 = pneg %p656_p5 }
 0x124   : > { %p663_p12 = por %p662_p6, %p661_p10 }
 0x126   : > { %p664_p8 = pnand %p663_p12, %p657_p0 }
 0x128   : > { %667 = shalt.err (!%p664_p8)
}
 0x129   : > { %s728_s4 = smov 512   ;;  %s729_s7 = smov 32  }
 0x12a   : > { %519 = dma.vmem_to_hbm [thread:$0]  (%p979_p11), %s921_s8, 1024, %s926_s19, %s388_s23, %s728_s4, %s728_s4, %s729_s7  }
 0x12b PF: > { %p530_p9 = scmp.ge.s32.totalorder %s706_s12, 2  ;;  %s417_s20 = sand.u32 1, %s694_s9  }
 0x12c   : > { %p980_p13 = scmp.ne.s32.totalorder %s977_s22, 0  ;;  %s418_s14 = scalar_lea.sflag [#allocation4], %s417_s20 }
 0x12e   : > { %p526_p1 = pnand %p530_p9, %p980_p13 }
 0x130   : > { %689 = dma.done.wait (!%p526_p1), %s418_s14, 1024  }
 0x131   : > { %691 = vsyncadd (!%p526_p1), %s418_s14, 4294966272  ;;  %p15_p3 = scmp.ge.s32.totalorder %s770_s15, 6   ;;  %s981_s9 = smov %s698_s10 }
 0x132   : > { %s982_s10 = smov %s702_s11  ;;  %s983_s11 = smov %s782_s18 }
 0x133   : > { %s984_s12 = smov %s770_s15  ;;  %17 = sbr.rel (!%p15_p3) target bundleno = 5 (0x5), region = 76 }
 0x13a   :  { %423 = vsyncpa [#allocation3], 1 }
 0x13b   :  { %425 = vsyncpa [#allocation3 + $0x1], 1 }
 0x13c   :  { %426 = vsyncpa [#allocation4], 1 }
 0x13d   :  { %428 = vsyncpa [#allocation4 + $0x1], 1 }

</bundles_post_ra>
